<compile_context>
chip_gen: v6e
topology: v6e:2x2x1
jax: 0.10.0
libtpu: 0.0.40
codegen_flags: <defaults>
</compile_context>

<pallas_src>
import functools

import jax
import jax.numpy as jnp
import numpy as np
from jax.experimental import pallas as pl
from jax.experimental.pallas import tpu as pltpu


def _round_up(x, m):
    return (x + m - 1) // m * m


def _deconv_kernel(w_ref, b_ref, x_ref, o_ref, *, taps, wp, m_lanes, ib):
    """One image group.

    For each image b in the block:
        out[b, co, m] = bias[co]
                      + sum_t  W[t, co, ci] * x[b, ci, m + kh*Wp + kw]
    where m = ho*Wp + wo is the flattened (stride-Wp) output position and the
    tap offsets kh*Wp + kw are compile-time constants (static lane slices).

    w_ref : (kH*kW, Co, Ci)  bf16, resident (constant index_map)
    b_ref : (Co, 128)        f32,  resident
    x_ref : (IB, Ci, Lp)     bf16, padded flattened images (channel-major)
    o_ref : (IB, Co, M)      f32,  flattened NCHW output rows
    """
    bias = b_ref[:, 0:1]                                    # (Co, 1) f32
    for b in range(ib):                                     # static unroll
        acc = None
        for t, (kh, kw) in enumerate(taps):                 # static unroll, 16 taps
            off = kh * wp + kw                               # Python int -> static slice
            xs = x_ref[b, :, off:off + m_lanes]              # (Ci, M) bf16
            part = jnp.dot(w_ref[t], xs,                     # (Co,Ci)@(Ci,M) -> f32
                           preferred_element_type=jnp.float32)
            acc = part if acc is None else acc + part
        o_ref[b] = acc + bias                                # (Co, M) f32, lane-dense


@functools.partial(jax.jit, static_argnames=("stride", "padding",
                                              "output_padding",
                                              "compute_dtype", "target_lanes"))
def deconv2d_pallas(x, weight, bias, *, stride=1, padding=1, output_padding=0,
                    compute_dtype=jnp.bfloat16, target_lanes=4096):
    """ConvTranspose2d forward matching PyTorch semantics (stride=1 path).

    x      : (N, Ci, H, W)     float32, NCHW
    weight : (Ci, Co, kH, kW)  float32 (PyTorch ConvTranspose2d layout)
    bias   : (Co,)             float32
    returns (N, Co, Ho, Wo), Ho = (H-1)*stride - 2*padding + kH + output_padding
    """
    # TODO(synk): stride>1 / output_padding>0 transposed-conv paths are not
    # implemented; the module defaults (stride=1, output_padding=0) are.
    assert stride == 1 and output_padding == 0
    N, Ci, H, W = x.shape
    wCi, Co, kH, kW = weight.shape
    assert wCi == Ci
    ph, pw = kH - 1 - padding, kW - 1 - padding
    assert ph >= 0 and pw >= 0, "requires padding <= kernel_size - 1"
    Ho = (H - 1) * stride - 2 * padding + kH + output_padding
    Wo = (W - 1) * stride - 2 * padding + kW + output_padding
    Hp, Wp = H + 2 * ph, W + 2 * pw

    # Per-image flattened lane extents (all 128 multiples -> no dead last tile,
    # unmasked lane-dense stores). Output rows keep stride Wp; the Wp-Wo tail
    # columns per row are garbage and sliced off afterwards.
    M = Ho * Wp
    Mp = _round_up(M, 128)
    max_off = (kH - 1) * Wp + (kW - 1)
    Lp = _round_up(Mp + max_off, 128)          # covers every static tap slice

    # Image-group size: big enough per step to amortize grid-step overhead,
    # but keep >= 2 grid steps (v7x has 2 TensorCores on the parallel axis).
    ib = max(1, min(N, target_lanes // Mp))
    if N >= 2:
        ib = min(ib, -(-N // 2))               # ceil(N/2) -> at least 2 steps
    Np = _round_up(N, ib)
    n_blocks = Np // ib

    # --- cheap wrapper prep: pad + flatten, stays channel-major (no im2col,
    # no transpose; one pass over the input). ---
    xp = jnp.pad(x, ((0, Np - N), (0, 0), (ph, ph), (pw, pw)))
    x_flat = xp.reshape(Np, Ci, Hp * Wp)
    x_flat = jnp.pad(x_flat, ((0, 0), (0, 0), (0, Lp - Hp * Wp)))
    x_flat = x_flat.astype(compute_dtype)

    # w_taps[kh*kW + kw, co, ci] = weight[ci, co, kH-1-kh, kW-1-kw]
    w_taps = jnp.transpose(jnp.flip(weight, axis=(2, 3)), (2, 3, 1, 0))
    w_taps = w_taps.reshape(kH * kW, Co, Ci).astype(compute_dtype)
    b_tile = jnp.broadcast_to(bias.astype(jnp.float32)[:, None], (Co, 128))

    taps = tuple((kh, kw) for kh in range(kH) for kw in range(kW))
    kernel = functools.partial(_deconv_kernel, taps=taps, wp=Wp,
                               m_lanes=Mp, ib=ib)

    out_flat = pl.pallas_call(
        kernel,
        out_shape=jax.ShapeDtypeStruct((Np, Co, Mp), jnp.float32),
        grid=(n_blocks,),
        in_specs=[
            pl.BlockSpec((kH * kW, Co, Ci), lambda g: (0, 0, 0)),  # weights (resident)
            pl.BlockSpec((Co, 128), lambda g: (0, 0)),             # bias (resident)
            pl.BlockSpec((ib, Ci, Lp), lambda g: (g, 0, 0)),       # image group
        ],
        out_specs=pl.BlockSpec((ib, Co, Mp), lambda g: (g, 0, 0)),
        compiler_params=pltpu.CompilerParams(
            dimension_semantics=("parallel",)),
    )(w_taps, b_tile, x_flat)

    # NCHW falls out directly: slice padded lanes / batch, no transpose.
    out = out_flat[:N, :, :M].reshape(N, Co, Ho, Wp)[:, :, :, :Wo]
    return out


def deconv2d_reference(x, weight, bias, *, stride=1, padding=1,
                       output_padding=0):
    """Independent pure-JAX reference: scatter definition of transposed conv
    (stride=1), full f32 precision."""
    N, Ci, H, W = x.shape
    _, Co, kH, kW = weight.shape
    Ho = (H - 1) * stride - 2 * padding + kH + output_padding
    Wo = (W - 1) * stride - 2 * padding + kW + output_padding
    full = jnp.zeros((N, Co, H + kH - 1, W + kW - 1), jnp.float32)
    for kh in range(kH):
        for kw in range(kW):
            contrib = jnp.einsum('nihw,io->nohw', x, weight[:, :, kh, kw],
                                 precision=jax.lax.Precision.HIGHEST)
            full = full.at[:, :, kh:kh + H, kw:kw + W].add(contrib)
    out = full[:, :, padding:padding + Ho, padding:padding + Wo]
    return out + bias[None, :, None, None]


if __name__ == "__main__":
    key = jax.random.PRNGKey(0)
    k1, k2, k3 = jax.random.split(key, 3)

    # Small shapes consistent with the module: nch_in=4, nch_out=8, k=4.
    N, Ci, Co, H, W = 2, 4, 8, 16, 16
    kH = kW = 4
    stride, padding, output_padding = 1, 1, 0

    x = jax.random.normal(k1, (N, Ci, H, W), jnp.float32)
    bound = 1.0 / float(np.sqrt(Ci * kH * kW))
    weight = jax.random.uniform(k2, (Ci, Co, kH, kW), jnp.float32, -bound, bound)
    bias = jax.random.uniform(k3, (Co,), jnp.float32, -bound, bound)

    out = deconv2d_pallas(x, weight, bias, stride=stride, padding=padding,
                          output_padding=output_padding)
    out = jax.block_until_ready(out)

    Ho = (H - 1) * stride - 2 * padding + kH + output_padding
    Wo = (W - 1) * stride - 2 * padding + kW + output_padding
    assert out.shape == (N, Co, Ho, Wo), out.shape

    # Tight check: same bf16-rounded operands fed to an exact-f32 reference
    # (isolates the intentional bf16 HBM-stream cast; kernel accumulates f32).
    xr = x.astype(jnp.bfloat16).astype(jnp.float32)
    wr = weight.astype(jnp.bfloat16).astype(jnp.float32)
    ref_bf = deconv2d_reference(xr, wr, bias, stride=stride, padding=padding,
                                output_padding=output_padding)
    np.testing.assert_allclose(np.asarray(out), np.asarray(ref_bf),
                               rtol=2e-3, atol=2e-3)

    # Loose check against the true f32 reference (bf16 operand rounding only).
    ref = deconv2d_reference(x, weight, bias, stride=stride, padding=padding,
                             output_padding=output_padding)
    np.testing.assert_allclose(np.asarray(out), np.asarray(ref),
                               rtol=3e-2, atol=3e-2)
    print("KERNEL_OK")
</pallas_src>

<mosaic_0001>
module attributes {stable_mosaic.version = 11 : i64} {
  func.func @_deconv_kernel(%arg0: i32, %arg1: memref<16x8x4xbf16, #tpu.memory_space<vmem>>, %arg2: memref<8x128xf32, #tpu.memory_space<vmem>>, %arg3: memref<1x4x512xbf16, #tpu.memory_space<vmem>>, %arg4: memref<1x8x384xf32, #tpu.memory_space<vmem>>) attributes {dimension_semantics = [#tpu.dimension_semantics<parallel>], iteration_bounds = array<i64: 2>, scalar_prefetch = 0 : i64, scratch_operands = 0 : i64, tpu.core_type = #tpu.core_type<tc>, window_params = [{pipeline_mode = #tpu.pipeline_mode<synchronous>, transform_indices = @transform_0, window_bounds = array<i64: 16, 8, 4>}, {pipeline_mode = #tpu.pipeline_mode<synchronous>, transform_indices = @transform_1, window_bounds = array<i64: 8, 128>}, {transform_indices = @transform_2, window_bounds = array<i64: 1, 4, 512>}, {transform_indices = @transform_3, window_bounds = array<i64: 1, 8, 384>}]} {
    %c0 = arith.constant 0 : index
    %c0_0 = arith.constant 0 : index
    %0 = vector.load %arg2[%c0, %c0_0] : memref<8x128xf32, #tpu.memory_space<vmem>>, vector<8x1xf32>
    %c0_1 = arith.constant 0 : index
    %c0_2 = arith.constant 0 : index
    %c0_3 = arith.constant 0 : index
    %1 = vector.load %arg3[%c0_1, %c0_2, %c0_3] : memref<1x4x512xbf16, #tpu.memory_space<vmem>>, vector<1x4x384xbf16>
    %2 = vector.shape_cast %1 : vector<1x4x384xbf16> to vector<4x384xbf16>
    %c0_4 = arith.constant 0 : index
    %c0_5 = arith.constant 0 : index
    %c0_6 = arith.constant 0 : index
    %3 = vector.load %arg1[%c0_4, %c0_5, %c0_6] : memref<16x8x4xbf16, #tpu.memory_space<vmem>>, vector<1x8x4xbf16>
    %4 = vector.shape_cast %3 : vector<1x8x4xbf16> to vector<8x4xbf16>
    %cst = arith.constant dense<0.000000e+00> : vector<8x384xf32>
    %5 = tpu.matmul %4, %2, %cst {dimension_numbers = #tpu.dot_dimension_numbers<[1], [0], [0], [1], [0, 0, 1, 1], [], []>} : vector<8x4xbf16>, vector<4x384xbf16>, vector<8x384xf32> -> vector<8x384xf32>
    %c0_7 = arith.constant 0 : index
    %c0_8 = arith.constant 0 : index
    %c1 = arith.constant 1 : index
    %6 = vector.load %arg3[%c0_7, %c0_8, %c1] : memref<1x4x512xbf16, #tpu.memory_space<vmem>>, vector<1x4x384xbf16>
    %7 = vector.shape_cast %6 : vector<1x4x384xbf16> to vector<4x384xbf16>
    %c1_9 = arith.constant 1 : index
    %c0_10 = arith.constant 0 : index
    %c0_11 = arith.constant 0 : index
    %8 = vector.load %arg1[%c1_9, %c0_10, %c0_11] : memref<16x8x4xbf16, #tpu.memory_space<vmem>>, vector<1x8x4xbf16>
    %9 = vector.shape_cast %8 : vector<1x8x4xbf16> to vector<8x4xbf16>
    %cst_12 = arith.constant dense<0.000000e+00> : vector<8x384xf32>
    %10 = tpu.matmul %9, %7, %cst_12 {dimension_numbers = #tpu.dot_dimension_numbers<[1], [0], [0], [1], [0, 0, 1, 1], [], []>} : vector<8x4xbf16>, vector<4x384xbf16>, vector<8x384xf32> -> vector<8x384xf32>
    %11 = arith.addf %5, %10 : vector<8x384xf32>
    %c0_13 = arith.constant 0 : index
    %c0_14 = arith.constant 0 : index
    %c2 = arith.constant 2 : index
    %12 = vector.load %arg3[%c0_13, %c0_14, %c2] : memref<1x4x512xbf16, #tpu.memory_space<vmem>>, vector<1x4x384xbf16>
    %13 = vector.shape_cast %12 : vector<1x4x384xbf16> to vector<4x384xbf16>
    %c2_15 = arith.constant 2 : index
    %c0_16 = arith.constant 0 : index
    %c0_17 = arith.constant 0 : index
    %14 = vector.load %arg1[%c2_15, %c0_16, %c0_17] : memref<16x8x4xbf16, #tpu.memory_space<vmem>>, vector<1x8x4xbf16>
    %15 = vector.shape_cast %14 : vector<1x8x4xbf16> to vector<8x4xbf16>
    %cst_18 = arith.constant dense<0.000000e+00> : vector<8x384xf32>
    %16 = tpu.matmul %15, %13, %cst_18 {dimension_numbers = #tpu.dot_dimension_numbers<[1], [0], [0], [1], [0, 0, 1, 1], [], []>} : vector<8x4xbf16>, vector<4x384xbf16>, vector<8x384xf32> -> vector<8x384xf32>
    %17 = arith.addf %11, %16 : vector<8x384xf32>
    %c0_19 = arith.constant 0 : index
    %c0_20 = arith.constant 0 : index
    %c3 = arith.constant 3 : index
    %18 = vector.load %arg3[%c0_19, %c0_20, %c3] : memref<1x4x512xbf16, #tpu.memory_space<vmem>>, vector<1x4x384xbf16>
    %19 = vector.shape_cast %18 : vector<1x4x384xbf16> to vector<4x384xbf16>
    %c3_21 = arith.constant 3 : index
    %c0_22 = arith.constant 0 : index
    %c0_23 = arith.constant 0 : index
    %20 = vector.load %arg1[%c3_21, %c0_22, %c0_23] : memref<16x8x4xbf16, #tpu.memory_space<vmem>>, vector<1x8x4xbf16>
    %21 = vector.shape_cast %20 : vector<1x8x4xbf16> to vector<8x4xbf16>
    %cst_24 = arith.constant dense<0.000000e+00> : vector<8x384xf32>
    %22 = tpu.matmul %21, %19, %cst_24 {dimension_numbers = #tpu.dot_dimension_numbers<[1], [0], [0], [1], [0, 0, 1, 1], [], []>} : vector<8x4xbf16>, vector<4x384xbf16>, vector<8x384xf32> -> vector<8x384xf32>
    %23 = arith.addf %17, %22 : vector<8x384xf32>
    %c0_25 = arith.constant 0 : index
    %c0_26 = arith.constant 0 : index
    %c20 = arith.constant 20 : index
    %24 = vector.load %arg3[%c0_25, %c0_26, %c20] : memref<1x4x512xbf16, #tpu.memory_space<vmem>>, vector<1x4x384xbf16>
    %25 = vector.shape_cast %24 : vector<1x4x384xbf16> to vector<4x384xbf16>
    %c4 = arith.constant 4 : index
    %c0_27 = arith.constant 0 : index
    %c0_28 = arith.constant 0 : index
    %26 = vector.load %arg1[%c4, %c0_27, %c0_28] : memref<16x8x4xbf16, #tpu.memory_space<vmem>>, vector<1x8x4xbf16>
    %27 = vector.shape_cast %26 : vector<1x8x4xbf16> to vector<8x4xbf16>
    %cst_29 = arith.constant dense<0.000000e+00> : vector<8x384xf32>
    %28 = tpu.matmul %27, %25, %cst_29 {dimension_numbers = #tpu.dot_dimension_numbers<[1], [0], [0], [1], [0, 0, 1, 1], [], []>} : vector<8x4xbf16>, vector<4x384xbf16>, vector<8x384xf32> -> vector<8x384xf32>
    %29 = arith.addf %23, %28 : vector<8x384xf32>
    %c0_30 = arith.constant 0 : index
    %c0_31 = arith.constant 0 : index
    %c21 = arith.constant 21 : index
    %30 = vector.load %arg3[%c0_30, %c0_31, %c21] : memref<1x4x512xbf16, #tpu.memory_space<vmem>>, vector<1x4x384xbf16>
    %31 = vector.shape_cast %30 : vector<1x4x384xbf16> to vector<4x384xbf16>
    %c5 = arith.constant 5 : index
    %c0_32 = arith.constant 0 : index
    %c0_33 = arith.constant 0 : index
    %32 = vector.load %arg1[%c5, %c0_32, %c0_33] : memref<16x8x4xbf16, #tpu.memory_space<vmem>>, vector<1x8x4xbf16>
    %33 = vector.shape_cast %32 : vector<1x8x4xbf16> to vector<8x4xbf16>
    %cst_34 = arith.constant dense<0.000000e+00> : vector<8x384xf32>
    %34 = tpu.matmul %33, %31, %cst_34 {dimension_numbers = #tpu.dot_dimension_numbers<[1], [0], [0], [1], [0, 0, 1, 1], [], []>} : vector<8x4xbf16>, vector<4x384xbf16>, vector<8x384xf32> -> vector<8x384xf32>
    %35 = arith.addf %29, %34 : vector<8x384xf32>
    %c0_35 = arith.constant 0 : index
    %c0_36 = arith.constant 0 : index
    %c22 = arith.constant 22 : index
    %36 = vector.load %arg3[%c0_35, %c0_36, %c22] : memref<1x4x512xbf16, #tpu.memory_space<vmem>>, vector<1x4x384xbf16>
    %37 = vector.shape_cast %36 : vector<1x4x384xbf16> to vector<4x384xbf16>
    %c6 = arith.constant 6 : index
    %c0_37 = arith.constant 0 : index
    %c0_38 = arith.constant 0 : index
    %38 = vector.load %arg1[%c6, %c0_37, %c0_38] : memref<16x8x4xbf16, #tpu.memory_space<vmem>>, vector<1x8x4xbf16>
    %39 = vector.shape_cast %38 : vector<1x8x4xbf16> to vector<8x4xbf16>
    %cst_39 = arith.constant dense<0.000000e+00> : vector<8x384xf32>
    %40 = tpu.matmul %39, %37, %cst_39 {dimension_numbers = #tpu.dot_dimension_numbers<[1], [0], [0], [1], [0, 0, 1, 1], [], []>} : vector<8x4xbf16>, vector<4x384xbf16>, vector<8x384xf32> -> vector<8x384xf32>
    %41 = arith.addf %35, %40 : vector<8x384xf32>
    %c0_40 = arith.constant 0 : index
    %c0_41 = arith.constant 0 : index
    %c23 = arith.constant 23 : index
    %42 = vector.load %arg3[%c0_40, %c0_41, %c23] : memref<1x4x512xbf16, #tpu.memory_space<vmem>>, vector<1x4x384xbf16>
    %43 = vector.shape_cast %42 : vector<1x4x384xbf16> to vector<4x384xbf16>
    %c7 = arith.constant 7 : index
    %c0_42 = arith.constant 0 : index
    %c0_43 = arith.constant 0 : index
    %44 = vector.load %arg1[%c7, %c0_42, %c0_43] : memref<16x8x4xbf16, #tpu.memory_space<vmem>>, vector<1x8x4xbf16>
    %45 = vector.shape_cast %44 : vector<1x8x4xbf16> to vector<8x4xbf16>
    %cst_44 = arith.constant dense<0.000000e+00> : vector<8x384xf32>
    %46 = tpu.matmul %45, %43, %cst_44 {dimension_numbers = #tpu.dot_dimension_numbers<[1], [0], [0], [1], [0, 0, 1, 1], [], []>} : vector<8x4xbf16>, vector<4x384xbf16>, vector<8x384xf32> -> vector<8x384xf32>
    %47 = arith.addf %41, %46 : vector<8x384xf32>
    %c0_45 = arith.constant 0 : index
    %c0_46 = arith.constant 0 : index
    %c40 = arith.constant 40 : index
    %48 = vector.load %arg3[%c0_45, %c0_46, %c40] : memref<1x4x512xbf16, #tpu.memory_space<vmem>>, vector<1x4x384xbf16>
    %49 = vector.shape_cast %48 : vector<1x4x384xbf16> to vector<4x384xbf16>
    %c8 = arith.constant 8 : index
    %c0_47 = arith.constant 0 : index
    %c0_48 = arith.constant 0 : index
    %50 = vector.load %arg1[%c8, %c0_47, %c0_48] : memref<16x8x4xbf16, #tpu.memory_space<vmem>>, vector<1x8x4xbf16>
    %51 = vector.shape_cast %50 : vector<1x8x4xbf16> to vector<8x4xbf16>
    %cst_49 = arith.constant dense<0.000000e+00> : vector<8x384xf32>
    %52 = tpu.matmul %51, %49, %cst_49 {dimension_numbers = #tpu.dot_dimension_numbers<[1], [0], [0], [1], [0, 0, 1, 1], [], []>} : vector<8x4xbf16>, vector<4x384xbf16>, vector<8x384xf32> -> vector<8x384xf32>
    %53 = arith.addf %47, %52 : vector<8x384xf32>
    %c0_50 = arith.constant 0 : index
    %c0_51 = arith.constant 0 : index
    %c41 = arith.constant 41 : index
    %54 = vector.load %arg3[%c0_50, %c0_51, %c41] : memref<1x4x512xbf16, #tpu.memory_space<vmem>>, vector<1x4x384xbf16>
    %55 = vector.shape_cast %54 : vector<1x4x384xbf16> to vector<4x384xbf16>
    %c9 = arith.constant 9 : index
    %c0_52 = arith.constant 0 : index
    %c0_53 = arith.constant 0 : index
    %56 = vector.load %arg1[%c9, %c0_52, %c0_53] : memref<16x8x4xbf16, #tpu.memory_space<vmem>>, vector<1x8x4xbf16>
    %57 = vector.shape_cast %56 : vector<1x8x4xbf16> to vector<8x4xbf16>
    %cst_54 = arith.constant dense<0.000000e+00> : vector<8x384xf32>
    %58 = tpu.matmul %57, %55, %cst_54 {dimension_numbers = #tpu.dot_dimension_numbers<[1], [0], [0], [1], [0, 0, 1, 1], [], []>} : vector<8x4xbf16>, vector<4x384xbf16>, vector<8x384xf32> -> vector<8x384xf32>
    %59 = arith.addf %53, %58 : vector<8x384xf32>
    %c0_55 = arith.constant 0 : index
    %c0_56 = arith.constant 0 : index
    %c42 = arith.constant 42 : index
    %60 = vector.load %arg3[%c0_55, %c0_56, %c42] : memref<1x4x512xbf16, #tpu.memory_space<vmem>>, vector<1x4x384xbf16>
    %61 = vector.shape_cast %60 : vector<1x4x384xbf16> to vector<4x384xbf16>
    %c10 = arith.constant 10 : index
    %c0_57 = arith.constant 0 : index
    %c0_58 = arith.constant 0 : index
    %62 = vector.load %arg1[%c10, %c0_57, %c0_58] : memref<16x8x4xbf16, #tpu.memory_space<vmem>>, vector<1x8x4xbf16>
    %63 = vector.shape_cast %62 : vector<1x8x4xbf16> to vector<8x4xbf16>
    %cst_59 = arith.constant dense<0.000000e+00> : vector<8x384xf32>
    %64 = tpu.matmul %63, %61, %cst_59 {dimension_numbers = #tpu.dot_dimension_numbers<[1], [0], [0], [1], [0, 0, 1, 1], [], []>} : vector<8x4xbf16>, vector<4x384xbf16>, vector<8x384xf32> -> vector<8x384xf32>
    %65 = arith.addf %59, %64 : vector<8x384xf32>
    %c0_60 = arith.constant 0 : index
    %c0_61 = arith.constant 0 : index
    %c43 = arith.constant 43 : index
    %66 = vector.load %arg3[%c0_60, %c0_61, %c43] : memref<1x4x512xbf16, #tpu.memory_space<vmem>>, vector<1x4x384xbf16>
    %67 = vector.shape_cast %66 : vector<1x4x384xbf16> to vector<4x384xbf16>
    %c11 = arith.constant 11 : index
    %c0_62 = arith.constant 0 : index
    %c0_63 = arith.constant 0 : index
    %68 = vector.load %arg1[%c11, %c0_62, %c0_63] : memref<16x8x4xbf16, #tpu.memory_space<vmem>>, vector<1x8x4xbf16>
    %69 = vector.shape_cast %68 : vector<1x8x4xbf16> to vector<8x4xbf16>
    %cst_64 = arith.constant dense<0.000000e+00> : vector<8x384xf32>
    %70 = tpu.matmul %69, %67, %cst_64 {dimension_numbers = #tpu.dot_dimension_numbers<[1], [0], [0], [1], [0, 0, 1, 1], [], []>} : vector<8x4xbf16>, vector<4x384xbf16>, vector<8x384xf32> -> vector<8x384xf32>
    %71 = arith.addf %65, %70 : vector<8x384xf32>
    %c0_65 = arith.constant 0 : index
    %c0_66 = arith.constant 0 : index
    %c60 = arith.constant 60 : index
    %72 = vector.load %arg3[%c0_65, %c0_66, %c60] : memref<1x4x512xbf16, #tpu.memory_space<vmem>>, vector<1x4x384xbf16>
    %73 = vector.shape_cast %72 : vector<1x4x384xbf16> to vector<4x384xbf16>
    %c12 = arith.constant 12 : index
    %c0_67 = arith.constant 0 : index
    %c0_68 = arith.constant 0 : index
    %74 = vector.load %arg1[%c12, %c0_67, %c0_68] : memref<16x8x4xbf16, #tpu.memory_space<vmem>>, vector<1x8x4xbf16>
    %75 = vector.shape_cast %74 : vector<1x8x4xbf16> to vector<8x4xbf16>
    %cst_69 = arith.constant dense<0.000000e+00> : vector<8x384xf32>
    %76 = tpu.matmul %75, %73, %cst_69 {dimension_numbers = #tpu.dot_dimension_numbers<[1], [0], [0], [1], [0, 0, 1, 1], [], []>} : vector<8x4xbf16>, vector<4x384xbf16>, vector<8x384xf32> -> vector<8x384xf32>
    %77 = arith.addf %71, %76 : vector<8x384xf32>
    %c0_70 = arith.constant 0 : index
    %c0_71 = arith.constant 0 : index
    %c61 = arith.constant 61 : index
    %78 = vector.load %arg3[%c0_70, %c0_71, %c61] : memref<1x4x512xbf16, #tpu.memory_space<vmem>>, vector<1x4x384xbf16>
    %79 = vector.shape_cast %78 : vector<1x4x384xbf16> to vector<4x384xbf16>
    %c13 = arith.constant 13 : index
    %c0_72 = arith.constant 0 : index
    %c0_73 = arith.constant 0 : index
    %80 = vector.load %arg1[%c13, %c0_72, %c0_73] : memref<16x8x4xbf16, #tpu.memory_space<vmem>>, vector<1x8x4xbf16>
    %81 = vector.shape_cast %80 : vector<1x8x4xbf16> to vector<8x4xbf16>
    %cst_74 = arith.constant dense<0.000000e+00> : vector<8x384xf32>
    %82 = tpu.matmul %81, %79, %cst_74 {dimension_numbers = #tpu.dot_dimension_numbers<[1], [0], [0], [1], [0, 0, 1, 1], [], []>} : vector<8x4xbf16>, vector<4x384xbf16>, vector<8x384xf32> -> vector<8x384xf32>
    %83 = arith.addf %77, %82 : vector<8x384xf32>
    %c0_75 = arith.constant 0 : index
    %c0_76 = arith.constant 0 : index
    %c62 = arith.constant 62 : index
    %84 = vector.load %arg3[%c0_75, %c0_76, %c62] : memref<1x4x512xbf16, #tpu.memory_space<vmem>>, vector<1x4x384xbf16>
    %85 = vector.shape_cast %84 : vector<1x4x384xbf16> to vector<4x384xbf16>
    %c14 = arith.constant 14 : index
    %c0_77 = arith.constant 0 : index
    %c0_78 = arith.constant 0 : index
    %86 = vector.load %arg1[%c14, %c0_77, %c0_78] : memref<16x8x4xbf16, #tpu.memory_space<vmem>>, vector<1x8x4xbf16>
    %87 = vector.shape_cast %86 : vector<1x8x4xbf16> to vector<8x4xbf16>
    %cst_79 = arith.constant dense<0.000000e+00> : vector<8x384xf32>
    %88 = tpu.matmul %87, %85, %cst_79 {dimension_numbers = #tpu.dot_dimension_numbers<[1], [0], [0], [1], [0, 0, 1, 1], [], []>} : vector<8x4xbf16>, vector<4x384xbf16>, vector<8x384xf32> -> vector<8x384xf32>
    %89 = arith.addf %83, %88 : vector<8x384xf32>
    %c0_80 = arith.constant 0 : index
    %c0_81 = arith.constant 0 : index
    %c63 = arith.constant 63 : index
    %90 = vector.load %arg3[%c0_80, %c0_81, %c63] : memref<1x4x512xbf16, #tpu.memory_space<vmem>>, vector<1x4x384xbf16>
    %91 = vector.shape_cast %90 : vector<1x4x384xbf16> to vector<4x384xbf16>
    %c15 = arith.constant 15 : index
    %c0_82 = arith.constant 0 : index
    %c0_83 = arith.constant 0 : index
    %92 = vector.load %arg1[%c15, %c0_82, %c0_83] : memref<16x8x4xbf16, #tpu.memory_space<vmem>>, vector<1x8x4xbf16>
    %93 = vector.shape_cast %92 : vector<1x8x4xbf16> to vector<8x4xbf16>
    %cst_84 = arith.constant dense<0.000000e+00> : vector<8x384xf32>
    %94 = tpu.matmul %93, %91, %cst_84 {dimension_numbers = #tpu.dot_dimension_numbers<[1], [0], [0], [1], [0, 0, 1, 1], [], []>} : vector<8x4xbf16>, vector<4x384xbf16>, vector<8x384xf32> -> vector<8x384xf32>
    %95 = arith.addf %89, %94 : vector<8x384xf32>
    %96 = vector.broadcast %0 : vector<8x1xf32> to vector<8x384xf32>
    %97 = arith.addf %95, %96 : vector<8x384xf32>
    %c0_85 = arith.constant 0 : index
    %c0_86 = arith.constant 0 : index
    %c0_87 = arith.constant 0 : index
    %98 = vector.load %arg4[%c0_85, %c0_86, %c0_87] : memref<1x8x384xf32, #tpu.memory_space<vmem>>, vector<1x8x384xf32>
    %99 = vector.shape_cast %98 : vector<1x8x384xf32> to vector<8x384xf32>
    %100 = vector.shape_cast %97 : vector<8x384xf32> to vector<1x8x384xf32>
    tpu.vector_store %arg4[%c0_85, %c0_86, %c0_87], %100 {strides = array<i32>} : memref<1x8x384xf32, #tpu.memory_space<vmem>>, vector<1x8x384xf32>,
    return
  }
  func.func @transform_0(%arg0: i32) -> (i32, i32, i32) {
    %c0_i32 = arith.constant 0 : i32
    %c0_i32_0 = arith.constant 0 : i32
    %c0_i32_1 = arith.constant 0 : i32
    %c0_i32_2 = arith.constant 0 : i32
    return %c0_i32, %c0_i32_0, %c0_i32_1 : i32, i32, i32
  }
  func.func @transform_1(%arg0: i32) -> (i32, i32) {
    %c0_i32 = arith.constant 0 : i32
    %c0_i32_0 = arith.constant 0 : i32
    %c0_i32_1 = arith.constant 0 : i32
    return %c0_i32, %c0_i32_0 : i32, i32
  }
  func.func @transform_2(%arg0: i32) -> (i32, i32, i32) {
    %c0_i32 = arith.constant 0 : i32
    %c0_i32_0 = arith.constant 0 : i32
    %c0_i32_1 = arith.constant 0 : i32
    return %arg0, %c0_i32, %c0_i32_0 : i32, i32, i32
  }
  func.func @transform_3(%arg0: i32) -> (i32, i32, i32) {
    %c0_i32 = arith.constant 0 : i32
    %c0_i32_0 = arith.constant 0 : i32
    %c0_i32_1 = arith.constant 0 : i32
    return %arg0, %c0_i32, %c0_i32_0 : i32, i32, i32
  }
}

</mosaic_0001>

<bundles_post_ra>
// kernel: deconv2d_pallas.1
= control target key start
LH: loop header
LB: loop body
LE: loop exit
PB: predicated region body
PF: predicated region fallthrough
CT: control target
= control target key end

     0   :  { %s2565_s12 = smov 0   ;;  %s2877_s0 = inlined_call_operand.vmem [shape: bf16[16,8,4], index: 0, kind: input, shape index: {}]   ;;  %s2878_s1 = inlined_call_operand.vmem [shape: f32[8,128], index: 1, kind: input, shape index: {}]   ;;  %s2879_s2 = inlined_call_operand.vmem [shape: bf16[2,4,512], index: 2, kind: input, shape index: {}]   ;;  %s2880_s3 = inlined_call_operand.vmem [shape: f32[2,8,384], index: 3, kind: output, shape index: {}]  }
   0x1 LB: > { %s2285_s13 = sadd.s32 4294967295, %s2524_s12   ;;  %p2289_p0 = scmp.ge.s32.totalorder %s2524_s12, 1  ;;  %s2524_s12 = sphi %s2565_s12, %s13_s12  }
   0x2   : > { %p137_p1 = scmp.lt.s32.totalorder %s2524_s12, 3 }
   0x4   : > { %p138_p2 = pnand %p2289_p0, %p137_p1 }
   0x5   : > { %p161_p3 = scmp.lt.s32.totalorder (!%p138_p2), %s2285_s13, 1  ;;  %s2530_s18 = smov (!%p138_p2), 127  }
   0x6   : > { %141 = sbr.rel (%p138_p2) target bundleno = 464 (0x1d0), region = 32  ;;  %s2531_s19 = smov (!%p138_p2), 126  }
   0x7   : > { %s2532_s20 = smov (!%p138_p2), 125   ;;  %s2533_s21 = smov (!%p138_p2), 108  }
   0x8   : > { %s2534_s22 = smov (!%p138_p2), 107   ;;  %s2535_s23 = smov (!%p138_p2), 106  }
   0x9   : > { %s2536_s24 = smov (!%p138_p2), 105   ;;  %s2537_s25 = smov (!%p138_p2), 88  }
   0xa   : > { %s2538_s26 = smov (!%p138_p2), 87   ;;  %s2539_s27 = smov (!%p138_p2), 86  }
   0xb   : > { %v183_v0 = vlaneseq  ;;  %v2526_v1 = vmov 1983009808   ;;  %s2882_s13 = smov (!%p161_p3, %s2285_s13), 1  ;;  %v2527_v5 = vmov 0.0   ;;  %v2528_v6 = vmov 0   ;;  %s2540_s28 = smov 85  }
   0xc   : > { %v181_v2 = vunpack.c.l.s4 %v2526_v1  ;;  %2391 = vmatprep.subr.bf16.mxu1 %v2527_v5  ;;  %254 = vmatprep.mubr.bf16.mxu0 %v2528_v6  ;;  %s2358_s14 = sshll.u32 %s2882_s13, 3  ;;  %vm2529_vm0 = vmmov 0   ;;  %s2541_s29 = smov 68   ;;  %vm204_vm1 = vcmask 1039360   ;;  %vm212_vm2 = vcmask 1041408   ;;  %v172_v22 = vld [vmem:[%s2878_s1] sm:$0xff] }
   0xd   : > { %v184_v3 = vshrl.u32 %v183_v0, 7  ;;  %2515 = vset.pattern.permute.xlu0 %v2528_v6  ;;  %s165_s17 = scalar_lea.vmem %s2879_s2, %s2358_s14  ;;  %2393 = vmatprep.mubr.msk.bf16.mxu1 %vm2529_vm0, %v2527_v5  ;;  %s2542_s30 = smov 67   ;;  %v2293_v28 = vld [vmem:[%s2877_s0 + $0x4] sm:$0xf]  ;;  %vm208_vm3 = vcmask 31744   ;;  %vm442_vm4 = vcmask 1031168  }
   0xe   : > { %v182_v4 = vunpack.c.0.s8 %v181_v2  ;;  %v175_v8 = vld [vmem:[%s165_s17] sm:$0xff]  ;;  %s2543_s4 = smov 66   ;;  %s2544_s5 = smov 65   ;;  %vm571_vm5 = vcmask 1022976   ;;  %v2300_v49 = vld [vmem:[%s2877_s0 + $0x8] sm:$0xf] }
   0xf   : > { %v173_v9 = vld [vmem:[%s165_s17] sm:$0x3f]  ;;  %v179_v11 = vcombine.high %v175_v8, %v175_v8  ;;  %vm700_vm6 = vcmask 883712   ;;  %v2304_v59 = vld [vmem:[%s2877_s0 + $0xc] sm:$0xf]  ;;  %vm829_vm7 = vcmask 875520  }
  0x10   : > { %v185_v7 = vsub.s32 %v182_v4, %v184_v3  ;;  %v304_v13 = vcombine.high %v173_v9, %v173_v9  ;;  %v174_v39 = vld [vmem:[%s2877_s0] sm:$0xf]  ;;  %vm958_vm8 = vcmask 867328   ;;  %vm1087_vm9 = vcmask 859136   ;;  %s2487_s17 = smul.u32 24, %s2882_s13 }
  0x11   : > { %vm1216_vm10 = vcmask 719872   ;;  %vm1345_vm11 = vcmask 711680   ;;  %vm1474_vm12 = vcmask 703488   ;;  %vm1603_vm13 = vcmask 695296  }
  0x12   : > { %v2584_v10 = vrot.slane %v175_v8, %v185_v7  ;;  %v2586_v12 = vrot.slane %v173_v9, %v185_v7  ;;  %v2593_v15 = vrot.slane %v179_v11, %v185_v7  ;;  %v2595_v16 = vrot.slane %v304_v13, %v185_v7  ;;  %v2308_v7 = vld [vmem:[%s2877_s0 + $0x10] sm:$0xf] }
  0x13   : > { %vm1732_vm14 = vcmask 556032   ;;  %vm1861_vm15 = vcmask 547840  }
  0x14   : > { %196 = vrot.lane.b32.xlu0 %v2584_v10, %s2530_s18  ;;  %v2591_v14 = vcombine.high %v2584_v10, %v2584_v10  ;;  %200 = vrot.lane.b32.xlu1 %v2593_v15, %s2530_s18  ;;  %v2600_v17 = vcombine.high %v2593_v15, %v2593_v15  ;;  %v319_v21 = vcombine.high %v2586_v12, %v2586_v12  ;;  %v324_v31 = vsel %vm212_vm2, %v2586_v12, 0 }
  0x15   : > { %v330_v33 = vsel %vm212_vm2, %v2595_v16, 0 }
  0x18   : > { %198 = vrot.lane.b32.xlu0 %v2591_v14, %s2530_s18  ;;  %202 = vrot.lane.b32.xlu1 %v2600_v17, %s2530_s18 }
  0x1c   : > { %434 = vrot.lane.b32.xlu0 %v2584_v10, %s2531_s19  ;;  %436 = vrot.lane.b32.xlu1 %v2591_v14, %s2531_s19 }
  0x20   : > { %438 = vrot.lane.b32.xlu0 %v2593_v15, %s2531_s19  ;;  %440 = vrot.lane.b32.xlu1 %v2600_v17, %s2531_s19 }
  0x24   : > { %563 = vrot.lane.b32.xlu0 %v2584_v10, %s2532_s20  ;;  %565 = vrot.lane.b32.xlu1 %v2591_v14, %s2532_s20 }
  0x28   : > { %567 = vrot.lane.b32.xlu0 %v2593_v15, %s2532_s20  ;;  %569 = vrot.lane.b32.xlu1 %v2600_v17, %s2532_s20  ;;  %s170_s20 = scalar_lea.vmem %s2880_s3, %s2487_s17 }
  0x2c   : > { %692 = vrot.lane.b32.xlu0 %v2584_v10, %s2533_s21  ;;  %694 = vrot.lane.b32.xlu1 %v2591_v14, %s2533_s21 }
  0x30   : > { %696 = vrot.lane.b32.xlu0 %v2593_v15, %s2533_s21  ;;  %698 = vrot.lane.b32.xlu1 %v2600_v17, %s2533_s21 }
  0x34   : > { %821 = vrot.lane.b32.xlu0 %v2584_v10, %s2534_s22  ;;  %823 = vrot.lane.b32.xlu1 %v2591_v14, %s2534_s22 }
  0x38   : > { %825 = vrot.lane.b32.xlu0 %v2593_v15, %s2534_s22  ;;  %827 = vrot.lane.b32.xlu1 %v2600_v17, %s2534_s22 }
  0x3c   : > { %950 = vrot.lane.b32.xlu0 %v2584_v10, %s2535_s23  ;;  %952 = vrot.lane.b32.xlu1 %v2591_v14, %s2535_s23 }
  0x40   : > { %954 = vrot.lane.b32.xlu0 %v2593_v15, %s2535_s23  ;;  %956 = vrot.lane.b32.xlu1 %v2600_v17, %s2535_s23 }
  0x44   : > { %1079 = vrot.lane.b32.xlu0 %v2584_v10, %s2536_s24  ;;  %1081 = vrot.lane.b32.xlu1 %v2591_v14, %s2536_s24 }
  0x48   : > { %1083 = vrot.lane.b32.xlu0 %v2593_v15, %s2536_s24  ;;  %1085 = vrot.lane.b32.xlu1 %v2600_v17, %s2536_s24 }
  0x4c   : > { %1208 = vrot.lane.b32.xlu0 %v2584_v10, %s2537_s25  ;;  %1210 = vrot.lane.b32.xlu1 %v2591_v14, %s2537_s25 }
  0x50   : > { %1212 = vrot.lane.b32.xlu0 %v2593_v15, %s2537_s25  ;;  %1214 = vrot.lane.b32.xlu1 %v2600_v17, %s2537_s25 }
  0x54   : > { %1337 = vrot.lane.b32.xlu0 %v2584_v10, %s2538_s26  ;;  %1339 = vrot.lane.b32.xlu1 %v2591_v14, %s2538_s26 }
  0x58   : > { %1341 = vrot.lane.b32.xlu0 %v2593_v15, %s2538_s26  ;;  %1343 = vrot.lane.b32.xlu1 %v2600_v17, %s2538_s26 }
  0x5c   : > { %1466 = vrot.lane.b32.xlu0 %v2584_v10, %s2539_s27  ;;  %1468 = vrot.lane.b32.xlu1 %v2591_v14, %s2539_s27 }
  0x60   : > { %1470 = vrot.lane.b32.xlu0 %v2593_v15, %s2539_s27  ;;  %1472 = vrot.lane.b32.xlu1 %v2600_v17, %s2539_s27 }
  0x64   : > { %1595 = vrot.lane.b32.xlu0 %v2584_v10, %s2540_s28  ;;  %1597 = vrot.lane.b32.xlu1 %v2591_v14, %s2540_s28 }
  0x68   : > { %1599 = vrot.lane.b32.xlu0 %v2593_v15, %s2540_s28  ;;  %1601 = vrot.lane.b32.xlu1 %v2600_v17, %s2540_s28 }
  0x6c   : > { %1724 = vrot.lane.b32.xlu0 %v2584_v10, %s2541_s29  ;;  %1726 = vrot.lane.b32.xlu1 %v2591_v14, %s2541_s29 }
  0x70   : > { %1728 = vrot.lane.b32.xlu0 %v2593_v15, %s2541_s29  ;;  %1730 = vrot.lane.b32.xlu1 %v2600_v17, %s2541_s29 }
  0x74   : > { %1853 = vrot.lane.b32.xlu0 %v2584_v10, %s2542_s30  ;;  %1855 = vrot.lane.b32.xlu1 %v2591_v14, %s2542_s30 }
  0x78   : > { %1857 = vrot.lane.b32.xlu0 %v2593_v15, %s2542_s30  ;;  %1859 = vrot.lane.b32.xlu1 %v2600_v17, %s2542_s30 }
  0x7c   : > { %1982 = vrot.lane.b32.xlu0 %v2584_v10, %s2543_s4  ;;  %1984 = vrot.lane.b32.xlu1 %v2591_v14, %s2543_s4 }
  0x80   : > { %1986 = vrot.lane.b32.xlu0 %v2593_v15, %s2543_s4  ;;  %1988 = vrot.lane.b32.xlu1 %v2600_v17, %s2543_s4 }
  0x84   : > { %2111 = vrot.lane.b32.xlu0 %v2584_v10, %s2544_s5  ;;  %2113 = vrot.lane.b32.xlu1 %v2591_v14, %s2544_s5 }
  0x86   : > { %v197_v18 = vpop.permute.xlu0 %196  ;;  %v201_v19 = vpop.permute.xlu1 %200 }
  0x88   : > { %2115 = vrot.lane.b32.xlu0 %v2593_v15, %s2544_s5  ;;  %2117 = vrot.lane.b32.xlu1 %v2600_v17, %s2544_s5  ;;  %v2312_v17 = vld [vmem:[%s2877_s0 + $0x14] sm:$0xf] }
  0x8a   : > { %v199_v20 = vpop.permute.xlu0 %198  ;;  %v203_v25 = vpop.permute.xlu1 %202 }
  0x8b   : > { %v206_v23 = vsel %vm204_vm1, %v199_v20, %v201_v19  ;;  %v205_v24 = vsel %vm204_vm1, %v197_v18, %v199_v20  ;;  %v207_v27 = vsel %vm204_vm1, %v201_v19, %v203_v25  ;;  %vm1990_vm1 = vcmask 539648  }
  0x8c   : > { %2294 = vmatprep.subr.msk.bf16.mxu0 %vm212_vm2, %v206_v23  ;;  %v214_v26 = vsel %vm212_vm2, %v205_v24, 0  ;;  %2221 = vperm.xlu0 %2515, %v172_v22   ;;  %v220_v29 = vsel %vm212_vm2, %v207_v27, 0  ;;  %v2316_v27 = vld [vmem:[%s2877_s0 + $0x18] sm:$0xf] }
  0x8d   : > { %237 = vmatpush1.bf16.msra.mxu0 %v214_v26  ;;  %2392 = vmatpush3.bf16.msra.mxu1 %v220_v29 }
  0x8e   : > { %v435_v30 = vpop.permute.xlu0 %434  ;;  %2297 = vmatprep.subr.msk.bf16.mxu0 %vm212_vm2, %v319_v21  ;;  %2397 = vmatprep.subr.bf16.mxu1 %v2527_v5  ;;  %v437_v32 = vpop.permute.xlu1 %436 }
  0x8f   : > { %v443_v35 = vsel %vm442_vm4, %v435_v30, %v437_v32 }
  0x90   : > { %2295 = vmatmul.mubr.msk.bf16.vlgmr.msra.gmra.mxu0 %vm208_vm3, %v2293_v28  ;;  %2394 = vmatmul.mubr.msk.bf16.vlgmr.msra.gmra.mxu1 %vm208_vm3, %v2293_v28  ;;  %v450_v40 = vsel %vm212_vm2, %v443_v35, 0 }
  0x91   : > { %347 = vmatpush1.bf16.msra.mxu0 %v324_v31  ;;  %364 = vmatprep.mubr.bf16.mxu0 %v2528_v6 }
  0x92   : > { %v439_v34 = vpop.permute.xlu0 %438  ;;  %2398 = vmatpush3.bf16.msra.mxu1 %v330_v33  ;;  %2399 = vmatprep.mubr.msk.bf16.mxu1 %vm2529_vm0, %v2527_v5  ;;  %v441_v37 = vpop.permute.xlu1 %440 }
  0x93   : > { %v444_v36 = vsel %vm442_vm4, %v437_v32, %v439_v34  ;;  %2403 = vmatprep.subr.bf16.mxu1 %v2527_v5  ;;  %v445_v38 = vsel %vm442_vm4, %v439_v34, %v441_v37  ;;  %v2320_v37 = vld [vmem:[%s2877_s0 + $0x1c] sm:$0xf]  ;;  %vm2119_vm4 = vcmask 531456  }
  0x94   : > { %2301 = vmatprep.subr.msk.bf16.mxu0 %vm212_vm2, %v444_v36  ;;  %v456_v42 = vsel %vm212_vm2, %v445_v38, 0 }
  0x96   : > { %v564_v41 = vpop.permute.xlu0 %563  ;;  %v566_v43 = vpop.permute.xlu1 %565 }
  0x97   : > { %v572_v45 = vsel %vm571_vm5, %v564_v41, %v566_v43 }
  0x98   : > { %2298 = vmatmul.mubr.msk.bf16.vlgmr.msra.gmra.mxu0 %vm208_vm3, %v174_v39  ;;  %2400 = vmatmul.mubr.msk.bf16.vlgmr.msra.gmra.mxu1 %vm208_vm3, %v174_v39  ;;  %v579_v50 = vsel %vm212_vm2, %v572_v45, 0 }
  0x99   : > { %473 = vmatpush1.bf16.msra.mxu0 %v450_v40  ;;  %490 = vmatprep.mubr.bf16.mxu0 %v2528_v6 }
  0x9a   : > { %v568_v44 = vpop.permute.xlu0 %567  ;;  %2404 = vmatpush3.bf16.msra.mxu1 %v456_v42  ;;  %2405 = vmatprep.mubr.msk.bf16.mxu1 %vm2529_vm0, %v2527_v5  ;;  %v570_v47 = vpop.permute.xlu1 %569 }
  0x9b   : > { %v573_v46 = vsel %vm571_vm5, %v566_v43, %v568_v44  ;;  %2409 = vmatprep.subr.bf16.mxu1 %v2527_v5  ;;  %v574_v48 = vsel %vm571_vm5, %v568_v44, %v570_v47  ;;  %v2324_v47 = vld [vmem:[%s2877_s0 + $0x20] sm:$0xf] }
  0x9c   : > { %2305 = vmatprep.subr.msk.bf16.mxu0 %vm212_vm2, %v573_v46  ;;  %v585_v52 = vsel %vm212_vm2, %v574_v48, 0 }
  0x9e   : > { %v693_v51 = vpop.permute.xlu0 %692  ;;  %v695_v53 = vpop.permute.xlu1 %694 }
  0x9f   : > { %v701_v55 = vsel %vm700_vm6, %v693_v51, %v695_v53 }
  0xa0   : > { %2302 = vmatmul.mubr.msk.bf16.vlgmr.msra.gmra.mxu0 %vm208_vm3, %v2300_v49  ;;  %2406 = vmatmul.mubr.msk.bf16.vlgmr.msra.gmra.mxu1 %vm208_vm3, %v2300_v49  ;;  %v708_v60 = vsel %vm212_vm2, %v701_v55, 0 }
  0xa1   : > { %602 = vmatpush1.bf16.msra.mxu0 %v579_v50  ;;  %619 = vmatprep.mubr.bf16.mxu0 %v2528_v6 }
  0xa2   : > { %v697_v54 = vpop.permute.xlu0 %696  ;;  %2410 = vmatpush3.bf16.msra.mxu1 %v585_v52  ;;  %2411 = vmatprep.mubr.msk.bf16.mxu1 %vm2529_vm0, %v2527_v5  ;;  %v699_v57 = vpop.permute.xlu1 %698 }
  0xa3   : > { %v702_v56 = vsel %vm700_vm6, %v695_v53, %v697_v54  ;;  %2415 = vmatprep.subr.bf16.mxu1 %v2527_v5  ;;  %v703_v58 = vsel %vm700_vm6, %v697_v54, %v699_v57  ;;  %v2328_v57 = vld [vmem:[%s2877_s0 + $0x24] sm:$0xf] }
  0xa4   : > { %2309 = vmatprep.subr.msk.bf16.mxu0 %vm212_vm2, %v702_v56  ;;  %v714_v62 = vsel %vm212_vm2, %v703_v58, 0 }
  0xa6   : > { %v822_v61 = vpop.permute.xlu0 %821  ;;  %v824_v63 = vpop.permute.xlu1 %823 }
  0xa7   : > { %v830_v1 = vsel %vm829_vm7, %v822_v61, %v824_v63 }
  0xa8   : > { %2306 = vmatmul.mubr.msk.bf16.vlgmr.msra.gmra.mxu0 %vm208_vm3, %v2304_v59  ;;  %2412 = vmatmul.mubr.msk.bf16.vlgmr.msra.gmra.mxu1 %vm208_vm3, %v2304_v59  ;;  %v837_v8 = vsel %vm212_vm2, %v830_v1, 0 }
  0xa9   : > { %731 = vmatpush1.bf16.msra.mxu0 %v708_v60  ;;  %748 = vmatprep.mubr.bf16.mxu0 %v2528_v6 }
  0xaa   : > { %v826_v0 = vpop.permute.xlu0 %825  ;;  %2416 = vmatpush3.bf16.msra.mxu1 %v714_v62  ;;  %2417 = vmatprep.mubr.msk.bf16.mxu1 %vm2529_vm0, %v2527_v5  ;;  %v828_v3 = vpop.permute.xlu1 %827 }
  0xab   : > { %v831_v2 = vsel %vm829_vm7, %v824_v63, %v826_v0  ;;  %2421 = vmatprep.subr.bf16.mxu1 %v2527_v5  ;;  %v832_v4 = vsel %vm829_vm7, %v826_v0, %v828_v3  ;;  %v2332_v3 = vld [vmem:[%s2877_s0 + $0x28] sm:$0xf] }
  0xac   : > { %2313 = vmatprep.subr.msk.bf16.mxu0 %vm212_vm2, %v831_v2  ;;  %v843_v10 = vsel %vm212_vm2, %v832_v4, 0 }
  0xae   : > { %v951_v9 = vpop.permute.xlu0 %950  ;;  %v953_v11 = vpop.permute.xlu1 %952 }
  0xaf   : > { %v959_v13 = vsel %vm958_vm8, %v951_v9, %v953_v11 }
  0xb0   : > { %2310 = vmatmul.mubr.msk.bf16.vlgmr.msra.gmra.mxu0 %vm208_vm3, %v2308_v7  ;;  %2418 = vmatmul.mubr.msk.bf16.vlgmr.msra.gmra.mxu1 %vm208_vm3, %v2308_v7  ;;  %v966_v18 = vsel %vm212_vm2, %v959_v13, 0 }
  0xb1   : > { %860 = vmatpush1.bf16.msra.mxu0 %v837_v8  ;;  %877 = vmatprep.mubr.bf16.mxu0 %v2528_v6 }
  0xb2   : > { %v955_v12 = vpop.permute.xlu0 %954  ;;  %2422 = vmatpush3.bf16.msra.mxu1 %v843_v10  ;;  %2423 = vmatprep.mubr.msk.bf16.mxu1 %vm2529_vm0, %v2527_v5  ;;  %v957_v15 = vpop.permute.xlu1 %956 }
  0xb3   : > { %v960_v14 = vsel %vm958_vm8, %v953_v11, %v955_v12  ;;  %2427 = vmatprep.subr.bf16.mxu1 %v2527_v5  ;;  %v961_v16 = vsel %vm958_vm8, %v955_v12, %v957_v15  ;;  %v2336_v15 = vld [vmem:[%s2877_s0 + $0x2c] sm:$0xf] }
  0xb4   : > { %2317 = vmatprep.subr.msk.bf16.mxu0 %vm212_vm2, %v960_v14  ;;  %v972_v20 = vsel %vm212_vm2, %v961_v16, 0 }
  0xb6   : > { %v1080_v19 = vpop.permute.xlu0 %1079  ;;  %v1082_v21 = vpop.permute.xlu1 %1081 }
  0xb7   : > { %v1088_v23 = vsel %vm1087_vm9, %v1080_v19, %v1082_v21 }
  0xb8   : > { %2314 = vmatmul.mubr.msk.bf16.vlgmr.msra.gmra.mxu0 %vm208_vm3, %v2312_v17  ;;  %2424 = vmatmul.mubr.msk.bf16.vlgmr.msra.gmra.mxu1 %vm208_vm3, %v2312_v17  ;;  %v1095_v28 = vsel %vm212_vm2, %v1088_v23, 0 }
  0xb9   : > { %989 = vmatpush1.bf16.msra.mxu0 %v966_v18  ;;  %1006 = vmatprep.mubr.bf16.mxu0 %v2528_v6 }
  0xba   : > { %v1084_v22 = vpop.permute.xlu0 %1083  ;;  %2428 = vmatpush3.bf16.msra.mxu1 %v972_v20  ;;  %2429 = vmatprep.mubr.msk.bf16.mxu1 %vm2529_vm0, %v2527_v5  ;;  %v1086_v25 = vpop.permute.xlu1 %1085 }
  0xbb   : > { %v1089_v24 = vsel %vm1087_vm9, %v1082_v21, %v1084_v22  ;;  %2433 = vmatprep.subr.bf16.mxu1 %v2527_v5  ;;  %v1090_v26 = vsel %vm1087_vm9, %v1084_v22, %v1086_v25  ;;  %v2340_v25 = vld [vmem:[%s2877_s0 + $0x30] sm:$0xf] }
  0xbc   : > { %2321 = vmatprep.subr.msk.bf16.mxu0 %vm212_vm2, %v1089_v24  ;;  %v1101_v30 = vsel %vm212_vm2, %v1090_v26, 0 }
  0xbe   : > { %v1209_v29 = vpop.permute.xlu0 %1208  ;;  %v1211_v31 = vpop.permute.xlu1 %1210 }
  0xbf   : > { %v1217_v33 = vsel %vm1216_vm10, %v1209_v29, %v1211_v31 }
  0xc0   : > { %2318 = vmatmul.mubr.msk.bf16.vlgmr.msra.gmra.mxu0 %vm208_vm3, %v2316_v27  ;;  %2430 = vmatmul.mubr.msk.bf16.vlgmr.msra.gmra.mxu1 %vm208_vm3, %v2316_v27  ;;  %v1224_v38 = vsel %vm212_vm2, %v1217_v33, 0 }
  0xc1   : > { %1118 = vmatpush1.bf16.msra.mxu0 %v1095_v28  ;;  %1135 = vmatprep.mubr.bf16.mxu0 %v2528_v6 }
  0xc2   : > { %v1213_v32 = vpop.permute.xlu0 %1212  ;;  %2434 = vmatpush3.bf16.msra.mxu1 %v1101_v30  ;;  %2435 = vmatprep.mubr.msk.bf16.mxu1 %vm2529_vm0, %v2527_v5  ;;  %v1215_v35 = vpop.permute.xlu1 %1214 }
  0xc3   : > { %v1218_v34 = vsel %vm1216_vm10, %v1211_v31, %v1213_v32  ;;  %2439 = vmatprep.subr.bf16.mxu1 %v2527_v5  ;;  %v1219_v36 = vsel %vm1216_vm10, %v1213_v32, %v1215_v35  ;;  %v2344_v35 = vld [vmem:[%s2877_s0 + $0x34] sm:$0xf] }
  0xc4   : > { %2325 = vmatprep.subr.msk.bf16.mxu0 %vm212_vm2, %v1218_v34  ;;  %v1230_v40 = vsel %vm212_vm2, %v1219_v36, 0 }
  0xc6   : > { %v1338_v39 = vpop.permute.xlu0 %1337  ;;  %v1340_v41 = vpop.permute.xlu1 %1339 }
  0xc7   : > { %v1346_v43 = vsel %vm1345_vm11, %v1338_v39, %v1340_v41 }
  0xc8   : > { %2322 = vmatmul.mubr.msk.bf16.vlgmr.msra.gmra.mxu0 %vm208_vm3, %v2320_v37  ;;  %2436 = vmatmul.mubr.msk.bf16.vlgmr.msra.gmra.mxu1 %vm208_vm3, %v2320_v37  ;;  %v1353_v48 = vsel %vm212_vm2, %v1346_v43, 0 }
  0xc9   : > { %1247 = vmatpush1.bf16.msra.mxu0 %v1224_v38  ;;  %1264 = vmatprep.mubr.bf16.mxu0 %v2528_v6 }
  0xca   : > { %v1342_v42 = vpop.permute.xlu0 %1341  ;;  %2440 = vmatpush3.bf16.msra.mxu1 %v1230_v40  ;;  %2441 = vmatprep.mubr.msk.bf16.mxu1 %vm2529_vm0, %v2527_v5  ;;  %v1344_v45 = vpop.permute.xlu1 %1343 }
  0xcb   : > { %v1347_v44 = vsel %vm1345_vm11, %v1340_v41, %v1342_v42  ;;  %2445 = vmatprep.subr.bf16.mxu1 %v2527_v5  ;;  %v1348_v46 = vsel %vm1345_vm11, %v1342_v42, %v1344_v45  ;;  %v2348_v45 = vld [vmem:[%s2877_s0 + $0x38] sm:$0xf] }
  0xcc   : > { %2329 = vmatprep.subr.msk.bf16.mxu0 %vm212_vm2, %v1347_v44  ;;  %v1359_v50 = vsel %vm212_vm2, %v1348_v46, 0 }
  0xce   : > { %v1467_v49 = vpop.permute.xlu0 %1466  ;;  %v1469_v51 = vpop.permute.xlu1 %1468 }
  0xcf   : > { %v1475_v53 = vsel %vm1474_vm12, %v1467_v49, %v1469_v51 }
  0xd0   : > { %2326 = vmatmul.mubr.msk.bf16.vlgmr.msra.gmra.mxu0 %vm208_vm3, %v2324_v47  ;;  %2442 = vmatmul.mubr.msk.bf16.vlgmr.msra.gmra.mxu1 %vm208_vm3, %v2324_v47  ;;  %v1482_v58 = vsel %vm212_vm2, %v1475_v53, 0 }
  0xd1   : > { %1376 = vmatpush1.bf16.msra.mxu0 %v1353_v48  ;;  %1393 = vmatprep.mubr.bf16.mxu0 %v2528_v6  ;;  %v2352_v48 = vld [vmem:[%s2877_s0 + $0x3c] sm:$0xf] }
  0xd2   : > { %v1471_v52 = vpop.permute.xlu0 %1470  ;;  %2446 = vmatpush3.bf16.msra.mxu1 %v1359_v50  ;;  %2447 = vmatprep.mubr.msk.bf16.mxu1 %vm2529_vm0, %v2527_v5  ;;  %v1473_v55 = vpop.permute.xlu1 %1472 }
  0xd3   : > { %v1476_v54 = vsel %vm1474_vm12, %v1469_v51, %v1471_v52  ;;  %2451 = vmatprep.subr.bf16.mxu1 %v2527_v5  ;;  %v1477_v56 = vsel %vm1474_vm12, %v1471_v52, %v1473_v55 }
  0xd4   : > { %2333 = vmatprep.subr.msk.bf16.mxu0 %vm212_vm2, %v1476_v54  ;;  %v1488_v60 = vsel %vm212_vm2, %v1477_v56, 0 }
  0xd6   : > { %v1596_v59 = vpop.permute.xlu0 %1595  ;;  %v1598_v61 = vpop.permute.xlu1 %1597 }
  0xd7   : > { %v1604_v63 = vsel %vm1603_vm13, %v1596_v59, %v1598_v61 }
  0xd8   : > { %2330 = vmatmul.mubr.msk.bf16.vlgmr.msra.gmra.mxu0 %vm208_vm3, %v2328_v57  ;;  %2448 = vmatmul.mubr.msk.bf16.vlgmr.msra.gmra.mxu1 %vm208_vm3, %v2328_v57  ;;  %v1611_v4 = vsel %vm212_vm2, %v1604_v63, 0 }
  0xd9   : > { %1505 = vmatpush1.bf16.msra.mxu0 %v1482_v58  ;;  %1522 = vmatprep.mubr.bf16.mxu0 %v2528_v6 }
  0xda   : > { %v1600_v62 = vpop.permute.xlu0 %1599  ;;  %2452 = vmatpush3.bf16.msra.mxu1 %v1488_v60  ;;  %2453 = vmatprep.mubr.msk.bf16.mxu1 %vm2529_vm0, %v2527_v5  ;;  %v1602_v1 = vpop.permute.xlu1 %1601 }
  0xdb   : > { %v1605_v0 = vsel %vm1603_vm13, %v1598_v61, %v1600_v62  ;;  %2457 = vmatprep.subr.bf16.mxu1 %v2527_v5  ;;  %v1606_v2 = vsel %vm1603_vm13, %v1600_v62, %v1602_v1 }
  0xdc   : > { %2337 = vmatprep.subr.msk.bf16.mxu0 %vm212_vm2, %v1605_v0  ;;  %v1617_v8 = vsel %vm212_vm2, %v1606_v2, 0 }
  0xde   : > { %v1725_v7 = vpop.permute.xlu0 %1724  ;;  %v1727_v9 = vpop.permute.xlu1 %1726 }
  0xdf   : > { %v1733_v11 = vsel %vm1732_vm14, %v1725_v7, %v1727_v9 }
  0xe0   : > { %2334 = vmatmul.mubr.msk.bf16.vlgmr.msra.gmra.mxu0 %vm208_vm3, %v2332_v3  ;;  %2454 = vmatmul.mubr.msk.bf16.vlgmr.msra.gmra.mxu1 %vm208_vm3, %v2332_v3  ;;  %v1740_v16 = vsel %vm212_vm2, %v1733_v11, 0 }
  0xe1   : > { %1634 = vmatpush1.bf16.msra.mxu0 %v1611_v4  ;;  %1651 = vmatprep.mubr.bf16.mxu0 %v2528_v6 }
  0xe2   : > { %v1729_v10 = vpop.permute.xlu0 %1728  ;;  %2458 = vmatpush3.bf16.msra.mxu1 %v1617_v8  ;;  %2459 = vmatprep.mubr.msk.bf16.mxu1 %vm2529_vm0, %v2527_v5  ;;  %v1731_v13 = vpop.permute.xlu1 %1730 }
  0xe3   : > { %v1734_v12 = vsel %vm1732_vm14, %v1727_v9, %v1729_v10  ;;  %2463 = vmatprep.subr.bf16.mxu1 %v2527_v5  ;;  %v1735_v14 = vsel %vm1732_vm14, %v1729_v10, %v1731_v13 }
  0xe4   : > { %2341 = vmatprep.subr.msk.bf16.mxu0 %vm212_vm2, %v1734_v12  ;;  %v1746_v18 = vsel %vm212_vm2, %v1735_v14, 0 }
  0xe6   : > { %v1854_v17 = vpop.permute.xlu0 %1853  ;;  %v1856_v19 = vpop.permute.xlu1 %1855 }
  0xe7   : > { %v1862_v21 = vsel %vm1861_vm15, %v1854_v17, %v1856_v19 }
  0xe8   : > { %2338 = vmatmul.mubr.msk.bf16.vlgmr.msra.gmra.mxu0 %vm208_vm3, %v2336_v15  ;;  %2460 = vmatmul.mubr.msk.bf16.vlgmr.msra.gmra.mxu1 %vm208_vm3, %v2336_v15  ;;  %v1869_v26 = vsel %vm212_vm2, %v1862_v21, 0 }
  0xe9   : > { %1763 = vmatpush1.bf16.msra.mxu0 %v1740_v16  ;;  %1780 = vmatprep.mubr.bf16.mxu0 %v2528_v6 }
  0xea   : > { %v1858_v20 = vpop.permute.xlu0 %1857  ;;  %2464 = vmatpush3.bf16.msra.mxu1 %v1746_v18  ;;  %2465 = vmatprep.mubr.msk.bf16.mxu1 %vm2529_vm0, %v2527_v5  ;;  %v1860_v23 = vpop.permute.xlu1 %1859 }
  0xeb   : > { %v1863_v22 = vsel %vm1861_vm15, %v1856_v19, %v1858_v20  ;;  %2469 = vmatprep.subr.bf16.mxu1 %v2527_v5  ;;  %v1864_v24 = vsel %vm1861_vm15, %v1858_v20, %v1860_v23 }
  0xec   : > { %2345 = vmatprep.subr.msk.bf16.mxu0 %vm212_vm2, %v1863_v22  ;;  %v1875_v28 = vsel %vm212_vm2, %v1864_v24, 0 }
  0xee   : > { %v1983_v27 = vpop.permute.xlu0 %1982  ;;  %v1985_v29 = vpop.permute.xlu1 %1984 }
  0xef   : > { %v1991_v31 = vsel %vm1990_vm1, %v1983_v27, %v1985_v29 }
  0xf0   : > { %2342 = vmatmul.mubr.msk.bf16.vlgmr.msra.gmra.mxu0 %vm208_vm3, %v2340_v25  ;;  %2466 = vmatmul.mubr.msk.bf16.vlgmr.msra.gmra.mxu1 %vm208_vm3, %v2340_v25  ;;  %v1998_v36 = vsel %vm212_vm2, %v1991_v31, 0 }
  0xf1   : > { %1892 = vmatpush1.bf16.msra.mxu0 %v1869_v26  ;;  %1909 = vmatprep.mubr.bf16.mxu0 %v2528_v6 }
  0xf2   : > { %v1987_v30 = vpop.permute.xlu0 %1986  ;;  %2470 = vmatpush3.bf16.msra.mxu1 %v1875_v28  ;;  %2471 = vmatprep.mubr.msk.bf16.mxu1 %vm2529_vm0, %v2527_v5  ;;  %v1989_v33 = vpop.permute.xlu1 %1988 }
  0xf3   : > { %v1992_v32 = vsel %vm1990_vm1, %v1985_v29, %v1987_v30  ;;  %2475 = vmatprep.subr.bf16.mxu1 %v2527_v5  ;;  %v1993_v34 = vsel %vm1990_vm1, %v1987_v30, %v1989_v33 }
  0xf4   : > { %2349 = vmatprep.subr.msk.bf16.mxu0 %vm212_vm2, %v1992_v32  ;;  %v2004_v38 = vsel %vm212_vm2, %v1993_v34, 0 }
  0xf6   : > { %v2112_v37 = vpop.permute.xlu0 %2111  ;;  %v2114_v39 = vpop.permute.xlu1 %2113 }
  0xf7   : > { %v2120_v41 = vsel %vm2119_vm4, %v2112_v37, %v2114_v39 }
  0xf8   : > { %2346 = vmatmul.mubr.msk.bf16.vlgmr.msra.gmra.mxu0 %vm208_vm3, %v2344_v35  ;;  %2472 = vmatmul.mubr.msk.bf16.vlgmr.msra.gmra.mxu1 %vm208_vm3, %v2344_v35  ;;  %v2127_v46 = vsel %vm212_vm2, %v2120_v41, 0 }
  0xf9   : > { %2021 = vmatpush1.bf16.msra.mxu0 %v1998_v36  ;;  %2038 = vmatprep.mubr.bf16.mxu0 %v2528_v6 }
  0xfa   : > { %v2116_v40 = vpop.permute.xlu0 %2115  ;;  %2476 = vmatpush3.bf16.msra.mxu1 %v2004_v38  ;;  %2477 = vmatprep.mubr.msk.bf16.mxu1 %vm2529_vm0, %v2527_v5  ;;  %v2118_v43 = vpop.permute.xlu1 %2117 }
  0xfb   : > { %v2121_v42 = vsel %vm2119_vm4, %v2114_v39, %v2116_v40  ;;  %2481 = vmatprep.subr.bf16.mxu1 %v2527_v5  ;;  %v2122_v44 = vsel %vm2119_vm4, %v2116_v40, %v2118_v43 }
  0xfc   : > { %2353 = vmatprep.subr.msk.bf16.mxu0 %vm212_vm2, %v2121_v42  ;;  %v2133_v47 = vsel %vm212_vm2, %v2122_v44, 0 }
 0x100   : > { %2350 = vmatmul.mubr.msk.bf16.vlgmr.msra.gmra.mxu0 %vm208_vm3, %v2348_v45  ;;  %2478 = vmatmul.mubr.msk.bf16.vlgmr.msra.gmra.mxu1 %vm208_vm3, %v2348_v45 }
 0x101   : > { %2150 = vmatpush1.bf16.msra.mxu0 %v2127_v46  ;;  %2167 = vmatprep.mubr.bf16.mxu0 %v2528_v6 }
 0x102   : > { %2482 = vmatpush3.bf16.msra.mxu1 %v2133_v47  ;;  %2483 = vmatprep.mubr.msk.bf16.mxu1 %vm2529_vm0, %v2527_v5 }
 0x108   : > { %2354 = vmatmul.mubr.msk.bf16.vlgmr.msra.gmra.mxu0 %vm208_vm3, %v2352_v48  ;;  %2484 = vmatmul.mubr.msk.bf16.vlgmr.msra.gmra.mxu1 %vm208_vm3, %v2352_v48 }
 0x150   : > { %v256_v49 = vpop.f32.mrf.mxu0  ;;  %v297_v51 = vpop.f32.mrf.mxu1 }
 0x152   : > { %v258_v50 = vpop.f32.mrf.mxu0  ;;  %v2395_v53 = vpop.f32.mrf.mxu1 }
 0x154   : > { %v260_v52 = vpop.f32.mrf.mxu0  ;;  %v300_v54 = vpop.f32.mrf.mxu1 }
 0x156   : > { %v261_v6 = vpop.f32.mrf.mxu0  ;;  %v2396_v55 = vpop.f32.mrf.mxu1 }
 0x158   : > { %v366_v56 = vpop.f32.mrf.mxu0  ;;  %v407_v5 = vpop.f32.mrf.mxu1 }
 0x159   : > { %v367_v57 = vadd.f32 %v366_v56, %v256_v49  ;;  %v408_v60 = vadd.f32 %v407_v5, %v297_v51 }
 0x15a   : > { %v368_v58 = vpop.f32.mrf.mxu0  ;;  %v2401_v62 = vpop.f32.mrf.mxu1 }
 0x15b   : > { %v369_v59 = vadd.f32 %v368_v58, %v258_v50 }
 0x15c   : > { %v370_v61 = vpop.f32.mrf.mxu0  ;;  %v410_v0 = vpop.f32.mrf.mxu1 }
 0x15e   : > { %v371_v63 = vpop.f32.mrf.mxu0  ;;  %v2402_v1 = vpop.f32.mrf.mxu1 }
 0x160   : > { %v492_v2 = vpop.f32.mrf.mxu0  ;;  %v533_v7 = vpop.f32.mrf.mxu1 }
 0x161   : > { %v539_v3 = vadd.f32 %v492_v2, %v367_v57  ;;  %v541_v9 = vadd.f32 %v533_v7, %v408_v60 }
 0x162   : > { %v494_v4 = vpop.f32.mrf.mxu0  ;;  %v2407_v11 = vpop.f32.mrf.mxu1 }
 0x163   : > { %v540_v8 = vadd.f32 %v494_v4, %v369_v59 }
 0x164   : > { %v496_v10 = vpop.f32.mrf.mxu0  ;;  %v536_v13 = vpop.f32.mrf.mxu1 }
 0x166   : > { %v497_v12 = vpop.f32.mrf.mxu0  ;;  %v2408_v14 = vpop.f32.mrf.mxu1 }
 0x168   : > { %v621_v15 = vpop.f32.mrf.mxu0  ;;  %v662_v18 = vpop.f32.mrf.mxu1 }
 0x169   : > { %v668_v16 = vadd.f32 %v621_v15, %v539_v3  ;;  %v670_v20 = vadd.f32 %v662_v18, %v541_v9 }
 0x16a   : > { %v623_v17 = vpop.f32.mrf.mxu0  ;;  %v2413_v22 = vpop.f32.mrf.mxu1 }
 0x16b   : > { %v669_v19 = vadd.f32 %v623_v17, %v540_v8 }
 0x16c   : > { %v625_v21 = vpop.f32.mrf.mxu0  ;;  %v665_v24 = vpop.f32.mrf.mxu1 }
 0x16e   : > { %v626_v23 = vpop.f32.mrf.mxu0  ;;  %v2414_v25 = vpop.f32.mrf.mxu1 }
 0x170   : > { %v750_v26 = vpop.f32.mrf.mxu0  ;;  %v791_v29 = vpop.f32.mrf.mxu1 }
 0x171   : > { %v2855_v27 = vadd.f32 %v750_v26, %v668_v16  ;;  %v2859_v31 = vadd.f32 %v791_v29, %v670_v20 }
 0x172   : > { %v752_v28 = vpop.f32.mrf.mxu0  ;;  %v2419_v33 = vpop.f32.mrf.mxu1 }
 0x173   : > { %v2857_v30 = vadd.f32 %v752_v28, %v669_v19 }
 0x174   : > { %v754_v32 = vpop.f32.mrf.mxu0  ;;  %v794_v35 = vpop.f32.mrf.mxu1 }
 0x176   : > { %v755_v34 = vpop.f32.mrf.mxu0  ;;  %v2420_v36 = vpop.f32.mrf.mxu1 }
 0x178   : > { %v879_v37 = vpop.f32.mrf.mxu0  ;;  %v2863_v39 = vpop.f32.mrf.mxu1 }
 0x17a   : > { %v2861_v38 = vpop.f32.mrf.mxu0  ;;  %v2425_v41 = vpop.f32.mrf.mxu1 }
 0x17c   : > { %v883_v40 = vpop.f32.mrf.mxu0  ;;  %v923_v43 = vpop.f32.mrf.mxu1 }
 0x17d   : > { %v926_v40 = vadd.f32 %v879_v37, %v2855_v27  ;;  %v927_v43 = vadd.f32 %v2861_v38, %v2857_v30 }
 0x17e   : > { %v884_v42 = vpop.f32.mrf.mxu0  ;;  %v2426_v44 = vpop.f32.mrf.mxu1 }
 0x17f   : > { %v928_v44 = vadd.f32 %v2863_v39, %v2859_v31 }
 0x180   : > { %v1008_v45 = vpop.f32.mrf.mxu0  ;;  %v1049_v47 = vpop.f32.mrf.mxu1 }
 0x182   : > { %v1010_v46 = vpop.f32.mrf.mxu0  ;;  %v2431_v49 = vpop.f32.mrf.mxu1 }
 0x184   : > { %v1012_v48 = vpop.f32.mrf.mxu0  ;;  %v1052_v51 = vpop.f32.mrf.mxu1 }
 0x185   : > { %v1055_v48 = vadd.f32 %v1008_v45, %v926_v40  ;;  %v1056_v51 = vadd.f32 %v1010_v46, %v927_v43 }
 0x186   : > { %v1013_v50 = vpop.f32.mrf.mxu0  ;;  %v2432_v52 = vpop.f32.mrf.mxu1 }
 0x187   : > { %v1057_v52 = vadd.f32 %v1049_v47, %v928_v44 }
 0x188   : > { %v1137_v53 = vpop.f32.mrf.mxu0  ;;  %v1178_v54 = vpop.f32.mrf.mxu1 }
 0x18a   : > { %v1139_v6 = vpop.f32.mrf.mxu0  ;;  %v2437_v56 = vpop.f32.mrf.mxu1 }
 0x18c   : > { %v1141_v55 = vpop.f32.mrf.mxu0  ;;  %v1181_v58 = vpop.f32.mrf.mxu1 }
 0x18d   : > { %v1184_v55 = vadd.f32 %v1137_v53, %v1055_v48  ;;  %v1185_v58 = vadd.f32 %v1139_v6, %v1056_v51 }
 0x18e   : > { %v1142_v57 = vpop.f32.mrf.mxu0  ;;  %v2438_v5 = vpop.f32.mrf.mxu1 }
 0x18f   : > { %v1186_v5 = vadd.f32 %v1178_v54, %v1057_v52 }
 0x190   : > { %v1266_v59 = vpop.f32.mrf.mxu0  ;;  %v1307_v61 = vpop.f32.mrf.mxu1 }
 0x192   : > { %v1268_v60 = vpop.f32.mrf.mxu0  ;;  %v2443_v63 = vpop.f32.mrf.mxu1 }
 0x193   : > { %v1314_v63 = vadd.f32 %v1268_v60, %v1185_v58 }
 0x194   : > { %v1270_v62 = vpop.f32.mrf.mxu0  ;;  %v1310_v1 = vpop.f32.mrf.mxu1 }
 0x195   : > { %v1313_v62 = vadd.f32 %v1266_v59, %v1184_v55 }
 0x196   : > { %v1271_v0 = vpop.f32.mrf.mxu0  ;;  %v2444_v2 = vpop.f32.mrf.mxu1 }
 0x197   : > { %v1315_v0 = vadd.f32 %v1307_v61, %v1186_v5 }
 0x198   : > { %v1395_v3 = vpop.f32.mrf.mxu0  ;;  %v1436_v7 = vpop.f32.mrf.mxu1 }
 0x199   : > { %v1442_v1 = vadd.f32 %v1395_v3, %v1313_v62  ;;  %v1444_v31 = vadd.f32 %v1436_v7, %v1315_v0 }
 0x19a   : > { %v1397_v4 = vpop.f32.mrf.mxu0  ;;  %v2449_v9 = vpop.f32.mrf.mxu1 }
 0x19b   : > { %v1443_v2 = vadd.f32 %v1397_v4, %v1314_v63 }
 0x19c   : > { %v1399_v8 = vpop.f32.mrf.mxu0  ;;  %v1439_v11 = vpop.f32.mrf.mxu1 }
 0x19e   : > { %v1400_v10 = vpop.f32.mrf.mxu0  ;;  %v2450_v12 = vpop.f32.mrf.mxu1 }
 0x1a0   : > { %v1524_v13 = vpop.f32.mrf.mxu0  ;;  %v1565_v15 = vpop.f32.mrf.mxu1 }
 0x1a1   : > { %v1571_v39 = vadd.f32 %v1524_v13, %v1442_v1  ;;  %v1573_v47 = vadd.f32 %v1565_v15, %v1444_v31 }
 0x1a2   : > { %v1526_v14 = vpop.f32.mrf.mxu0  ;;  %v2455_v17 = vpop.f32.mrf.mxu1 }
 0x1a3   : > { %v1572_v46 = vadd.f32 %v1526_v14, %v1443_v2 }
 0x1a4   : > { %v1528_v16 = vpop.f32.mrf.mxu0  ;;  %v1568_v19 = vpop.f32.mrf.mxu1 }
 0x1a6   : > { %v1529_v18 = vpop.f32.mrf.mxu0  ;;  %v2456_v20 = vpop.f32.mrf.mxu1 }
 0x1a7   : > { %v2222_v18 = vpop.permute.xlu0 %2221 }
 0x1a8   : > { %v1653_v21 = vpop.f32.mrf.mxu0  ;;  %v1694_v23 = vpop.f32.mrf.mxu1 }
 0x1a9   : > { %v1700_v53 = vadd.f32 %v1653_v21, %v1571_v39  ;;  %v1702_v59 = vadd.f32 %v1694_v23, %v1573_v47 }
 0x1aa   : > { %v1655_v22 = vpop.f32.mrf.mxu0  ;;  %v2461_v25 = vpop.f32.mrf.mxu1 }
 0x1ab   : > { %v1701_v54 = vadd.f32 %v1655_v22, %v1572_v46 }
 0x1ac   : > { %v1657_v24 = vpop.f32.mrf.mxu0  ;;  %v1697_v28 = vpop.f32.mrf.mxu1 }
 0x1ae   : > { %v1658_v26 = vpop.f32.mrf.mxu0  ;;  %v2462_v29 = vpop.f32.mrf.mxu1 }
 0x1b0   : > { %v1782_v32 = vpop.f32.mrf.mxu0  ;;  %v1823_v34 = vpop.f32.mrf.mxu1 }
 0x1b1   : > { %v1829_v10 = vadd.f32 %v1782_v32, %v1700_v53  ;;  %v1831_v3 = vadd.f32 %v1823_v34, %v1702_v59 }
 0x1b2   : > { %v1784_v33 = vpop.f32.mrf.mxu0  ;;  %v2467_v36 = vpop.f32.mrf.mxu1 }
 0x1b3   : > { %v1830_v61 = vadd.f32 %v1784_v33, %v1701_v54 }
 0x1b4   : > { %v1786_v35 = vpop.f32.mrf.mxu0  ;;  %v1826_v42 = vpop.f32.mrf.mxu1 }
 0x1b6   : > { %v1787_v41 = vpop.f32.mrf.mxu0  ;;  %v2468_v49 = vpop.f32.mrf.mxu1 }
 0x1b8   : > { %v1911_v50 = vpop.f32.mrf.mxu0  ;;  %v1952_v57 = vpop.f32.mrf.mxu1 }
 0x1b9   : > { %v1958_v12 = vadd.f32 %v1911_v50, %v1829_v10  ;;  %v1960_v13 = vadd.f32 %v1952_v57, %v1831_v3 }
 0x1ba   : > { %v1913_v56 = vpop.f32.mrf.mxu0  ;;  %v2473_v37 = vpop.f32.mrf.mxu1 }
 0x1bb   : > { %v1959_v7 = vadd.f32 %v1913_v56, %v1830_v61 }
 0x1bc   : > { %v1915_v27 = vpop.f32.mrf.mxu0  ;;  %v1955_v38 = vpop.f32.mrf.mxu1 }
 0x1be   : > { %v1916_v30 = vpop.f32.mrf.mxu0  ;;  %v2474_v45 = vpop.f32.mrf.mxu1 }
 0x1c0   : > { %v2040_v8 = vpop.f32.mrf.mxu0  ;;  %v2081_v6 = vpop.f32.mrf.mxu1 }
 0x1c1   : > { %v2087_v17 = vadd.f32 %v2040_v8, %v1958_v12  ;;  %v2089_v20 = vadd.f32 %v2081_v6, %v1960_v13 }
 0x1c2   : > { %v2042_v9 = vpop.f32.mrf.mxu0  ;;  %v2479_v60 = vpop.f32.mrf.mxu1 }
 0x1c3   : > { %v2088_v19 = vadd.f32 %v2042_v9, %v1959_v7 }
 0x1c4   : > { %v2044_v11 = vpop.f32.mrf.mxu0  ;;  %v2084_v4 = vpop.f32.mrf.mxu1 }
 0x1c6   : > { %v2045_v16 = vpop.f32.mrf.mxu0  ;;  %v2480_v14 = vpop.f32.mrf.mxu1 }
 0x1c8   : > { %v2169_v15 = vpop.f32.mrf.mxu0  ;;  %v2210_v23 = vpop.f32.mrf.mxu1 }
 0x1c9   : > { %v2216_v21 = vadd.f32 %v2169_v15, %v2087_v17  ;;  %v2218_v26 = vadd.f32 %v2210_v23, %v2089_v20 }
 0x1ca   : > { %v2171_v22 = vpop.f32.mrf.mxu0  ;;  %v2485_v29 = vpop.f32.mrf.mxu1 }
 0x1cb   : > { %v2224_v24 = vadd.f32 %v2222_v18, %v2216_v21  ;;  %v2217_v25 = vadd.f32 %v2171_v22, %v2088_v19  ;;  %v2226_v33 = vadd.f32 %v2222_v18, %v2218_v26 }
 0x1cc   : > { %v2173_v28 = vpop.f32.mrf.mxu0  ;;  %v2213_v35 = vpop.f32.mrf.mxu1 }
 0x1cd   : > { %2227 = vst [vmem:[%s170_s20] sm:$0xff] %v2224_v24  ;;  %v2225_v32 = vadd.f32 %v2222_v18, %v2217_v25  ;;  %2229 = vst [vmem:[%s170_s20 + $0x10] sm:$0xff] %v2226_v33 }
 0x1ce   : > { %v2174_v34 = vpop.f32.mrf.mxu0  ;;  %v2486_v36 = vpop.f32.mrf.mxu1 }
 0x1cf   : > { %2228 = vst [vmem:[%s170_s20 + $0x8] sm:$0xff] %v2225_v32 }
 0x1d0 PF: > { %s13_s12 = sadd.s32 1, %s2524_s12  }
 0x1d1   : > { %p10_p4 = scmp.ge.s32.totalorder %s13_s12, 4  }
 0x1d3   :  { %12 = sbr.rel (!%p10_p4) target bundleno = 1 (0x1), region = 77 }

</bundles_post_ra>
